<compile_context>
chip_gen: v5e
topology: v5e:2x2
jax: 0.10.0
libtpu: 0.0.40
codegen_flags: <defaults>
</compile_context>

<pallas_src>
import functools

import jax
import jax.numpy as jnp
from jax.experimental import pallas as pl
from jax.experimental.pallas import tpu as pltpu

# ImageNet normalization constants (same values as the PyTorch module __init__).
_MEAN = (0.485, 0.456, 0.406)
_STD = (0.229, 0.224, 0.225)

_TILE_BYTES = 4 * 1024 * 1024       # per-tile cap (re-derived for v7x's 64 MiB VMEM)
_FAST_PATH_BYTES = 1 * 1024 * 1024  # below this, plain-JAX FMA beats kernel launch


def _norm_kernel(x_ref, scale_ref, bias_ref, o_ref):
    # x_ref / o_ref: (row_tile, lane_tile) tile of the (N*C, H*W) view.
    # scale_ref / bias_ref: (row_tile, 1) per-row constants, broadcast over lanes.
    x = x_ref[...].astype(jnp.float32)
    o_ref[...] = (x * scale_ref[...] + bias_ref[...]).astype(o_ref.dtype)


def _pick_row_tile(nc: int) -> int:
    """Full extent when small (always legal), else a bounded multiple of 8/16.

    pl.cdiv handles the ragged last block, so no divisibility constraint on nc.
    """
    if nc <= 256:
        return nc
    return 256  # multiple of 8 (f32) and 16 (bf16 sublane packing)


def _pick_lane_tile(hw: int, row_tile: int, itemsize: int) -> int:
    """Prefer the full H*W row when it fits the byte cap (one contiguous DMA per
    row tile, degenerate lane grid axis).  Otherwise pick the largest multiple
    of 128 under the cap; pl.cdiv pads the ragged edge block."""
    bpe = max(itemsize, 4)  # budget against the f32 compute path
    if row_tile * hw * bpe <= _TILE_BYTES:
        return hw
    lane = (_TILE_BYTES // (row_tile * bpe)) // 128 * 128
    return max(128, int(lane))


def normalization_forward(img: jax.Array, *, use_pallas=None) -> jax.Array:
    """(img - mean.view(1,3,1,1)) / std.view(1,3,1,1), img in NCHW layout."""
    n, c, h, w = img.shape
    assert c == 3, "Normalization expects 3-channel (RGB) input in NCHW layout"
    nc, hw = n * c, h * w

    # PyTorch promotes integer images to float; keep float inputs' dtype.
    out_dtype = img.dtype if jnp.issubdtype(img.dtype, jnp.floating) else jnp.float32

    # Fold mean/std into scale/bias once on the host/XLA side.
    mean = jnp.asarray(_MEAN, dtype=jnp.float32)
    std = jnp.asarray(_STD, dtype=jnp.float32)
    scale = 1.0 / std
    bias = -mean / std

    if use_pallas is None:
        use_pallas = img.size * jnp.dtype(out_dtype).itemsize >= _FAST_PATH_BYTES

    if not use_pallas:
        # Tiny-tensor fast path: kernel launch overhead would dominate.
        out = img.astype(jnp.float32) * scale.reshape(1, 3, 1, 1) + bias.reshape(1, 3, 1, 1)
        return out.astype(out_dtype)

    # Row r of the flattened (N*C, H*W) view has channel r % 3.
    scale_rows = jnp.tile(scale, n).reshape(nc, 1)
    bias_rows = jnp.tile(bias, n).reshape(nc, 1)

    # Contiguous (free) reshape: lane-dense last axis of size H*W.
    x2 = img.reshape(nc, hw)

    in_itemsize = jnp.dtype(img.dtype).itemsize
    out_itemsize = jnp.dtype(out_dtype).itemsize
    row_tile = _pick_row_tile(nc)
    lane_tile = _pick_lane_tile(hw, row_tile, max(in_itemsize, out_itemsize))
    grid = (pl.cdiv(nc, row_tile), pl.cdiv(hw, lane_tile))  # lanes innermost

    # Explicit scoped-VMEM budget: double-buffered input + output tiles plus
    # the lane-padded (row_tile, 1) -> (row_tile, 128) scale/bias tiles.
    in_tile_b = row_tile * lane_tile * in_itemsize
    out_tile_b = row_tile * lane_tile * out_itemsize
    const_tile_b = row_tile * 128 * 4
    budget = 2 * (in_tile_b + out_tile_b + 2 * const_tile_b)
    vmem_limit = int(min(max(budget + (4 << 20), 16 << 20), 48 << 20))

    grid_spec = pltpu.PrefetchScalarGridSpec(
        num_scalar_prefetch=0,
        grid=grid,
        in_specs=[
            pl.BlockSpec((row_tile, lane_tile), lambda i, j: (i, j)),
            pl.BlockSpec((row_tile, 1), lambda i, j: (i, 0)),
            pl.BlockSpec((row_tile, 1), lambda i, j: (i, 0)),
        ],
        out_specs=pl.BlockSpec((row_tile, lane_tile), lambda i, j: (i, j)),
    )

    out2 = pl.pallas_call(
        _norm_kernel,
        out_shape=jax.ShapeDtypeStruct((nc, hw), out_dtype),
        grid_spec=grid_spec,
        compiler_params=pltpu.CompilerParams(
            # Pure elementwise op: both axes parallel so v7x's two TensorCores
            # split the HBM-streaming work.  No-op on single-TC v5e/v6e.
            dimension_semantics=("parallel", "parallel"),
            vmem_limit_bytes=vmem_limit,
        ),
    )(x2, scale_rows, bias_rows)

    return out2.reshape(n, c, h, w)


normalization_forward_jit = jax.jit(
    normalization_forward, static_argnames=("use_pallas",)
)


if __name__ == "__main__":
    key = jax.random.PRNGKey(0)
    # Small NCHW image batch: batch=2, channels=3 (module hardcodes 3), 16x16 spatial.
    img = jax.random.uniform(key, (2, 3, 16, 16), dtype=jnp.float32)

    mean = jnp.asarray(_MEAN, dtype=jnp.float32).reshape(1, 3, 1, 1)
    std = jnp.asarray(_STD, dtype=jnp.float32).reshape(1, 3, 1, 1)
    ref = (img - mean) / std

    # 1) Force the Pallas path on the small input (default dispatch would take
    #    the fast path for a tensor this tiny).
    out_pallas = jax.block_until_ready(normalization_forward_jit(img, use_pallas=True))
    assert out_pallas.shape == img.shape and out_pallas.dtype == img.dtype
    assert jnp.allclose(out_pallas, ref, atol=1e-5, rtol=1e-5)

    # 2) Default dispatch (small-input fast path) gives the same result.
    out_auto = jax.block_until_ready(normalization_forward_jit(img))
    assert jnp.allclose(out_auto, ref, atol=1e-5, rtol=1e-5)

    # 3) Awkward spatial shape (H*W not a multiple of 128) through the Pallas
    #    path exercises the robust tile pickers.
    img2 = jax.random.uniform(jax.random.PRNGKey(0), (2, 3, 17, 19), dtype=jnp.float32)
    ref2 = (img2 - mean) / std
    out2 = jax.block_until_ready(normalization_forward_jit(img2, use_pallas=True))
    assert jnp.allclose(out2, ref2, atol=1e-5, rtol=1e-5)

    print("KERNEL_OK")
</pallas_src>

<mosaic_0001>
module attributes {stable_mosaic.version = 11 : i64} {
  func.func @_norm_kernel(%arg0: i32, %arg1: i32, %arg2: memref<6x256xf32, #tpu.memory_space<vmem>>, %arg3: memref<6x1xf32, #tpu.memory_space<vmem>>, %arg4: memref<6x1xf32, #tpu.memory_space<vmem>>, %arg5: memref<6x256xf32, #tpu.memory_space<vmem>>) attributes {dimension_semantics = [#tpu.dimension_semantics<parallel>, #tpu.dimension_semantics<parallel>], iteration_bounds = array<i64: 1, 1>, scalar_prefetch = 0 : i64, scratch_operands = 0 : i64, tpu.core_type = #tpu.core_type<tc>, window_params = [{transform_indices = @transform_0, window_bounds = array<i64: 6, 256>}, {transform_indices = @transform_1, window_bounds = array<i64: 6, 1>}, {transform_indices = @transform_2, window_bounds = array<i64: 6, 1>}, {transform_indices = @transform_3, window_bounds = array<i64: 6, 256>}]} {
    %c0 = arith.constant 0 : index
    %c0_0 = arith.constant 0 : index
    %0 = vector.load %arg2[%c0, %c0_0] : memref<6x256xf32, #tpu.memory_space<vmem>>, vector<6x256xf32>
    %c0_1 = arith.constant 0 : index
    %c0_2 = arith.constant 0 : index
    %1 = vector.load %arg3[%c0_1, %c0_2] : memref<6x1xf32, #tpu.memory_space<vmem>>, vector<6x1xf32>
    %2 = vector.broadcast %1 : vector<6x1xf32> to vector<6x256xf32>
    %3 = arith.mulf %0, %2 : vector<6x256xf32>
    %c0_3 = arith.constant 0 : index
    %c0_4 = arith.constant 0 : index
    %4 = vector.load %arg4[%c0_3, %c0_4] : memref<6x1xf32, #tpu.memory_space<vmem>>, vector<6x1xf32>
    %5 = vector.broadcast %4 : vector<6x1xf32> to vector<6x256xf32>
    %6 = arith.addf %3, %5 : vector<6x256xf32>
    %c0_5 = arith.constant 0 : index
    %c0_6 = arith.constant 0 : index
    %7 = vector.load %arg5[%c0_5, %c0_6] : memref<6x256xf32, #tpu.memory_space<vmem>>, vector<6x256xf32>
    tpu.vector_store %arg5[%c0_5, %c0_6], %6 {strides = array<i32>} : memref<6x256xf32, #tpu.memory_space<vmem>>, vector<6x256xf32>,
    return
  }
  func.func @transform_0(%arg0: i32, %arg1: i32) -> (i32, i32) {
    %c0_i32 = arith.constant 0 : i32
    return %arg0, %arg1 : i32, i32
  }
  func.func @transform_1(%arg0: i32, %arg1: i32) -> (i32, i32) {
    %c0_i32 = arith.constant 0 : i32
    %c0_i32_0 = arith.constant 0 : i32
    return %arg0, %c0_i32 : i32, i32
  }
  func.func @transform_2(%arg0: i32, %arg1: i32) -> (i32, i32) {
    %c0_i32 = arith.constant 0 : i32
    %c0_i32_0 = arith.constant 0 : i32
    return %arg0, %c0_i32 : i32, i32
  }
  func.func @transform_3(%arg0: i32, %arg1: i32) -> (i32, i32) {
    %c0_i32 = arith.constant 0 : i32
    return %arg0, %arg1 : i32, i32
  }
}

</mosaic_0001>

<bundles_post_ra>
// kernel: tile.14
= control target key start
LH: loop header
LB: loop body
LE: loop exit
PB: predicated region body
PF: predicated region fallthrough
CT: control target
= control target key end

     0   :  { %s22_s0 = inlined_call_operand.vmem [shape: f32[3], index: 0, kind: input, shape index: {}]   ;;  %s23_s1 = inlined_call_operand.vmem [shape: f32[2,3], index: 1, kind: output, shape index: {}]  }
   0x1   :  { %v4_v0 = vld [vmem:[%s22_s0] ss:$0 sm:$0xff] }
   0x2   :  { %5 = vst [vmem:[%s23_s1] sm:$0x3] %v4_v0 }

// kernel: tile.1
= control target key start
LH: loop header
LB: loop body
LE: loop exit
PB: predicated region body
PF: predicated region fallthrough
CT: control target
= control target key end

     0   :  { %s26_s8 = smov 126   ;;  %vm7_vm0 = vcmask 7168   ;;  %s49_s0 = inlined_call_operand.vmem [shape: f32[2,3], index: 0, kind: input, shape index: {}]   ;;  %s50_s1 = inlined_call_operand.vmem [shape: f32[6,1], index: 1, kind: output, shape index: {}]  }
   0x1   :  { %v4_v0 = vld [vmem:[%s49_s0] sm:$0x3]  ;;  %s25_s0 = smov 127  }
   0x2   :  { %5 = vst [vmem:[#allocation0] sm:$0x3] %v4_v0 }
   0x9   :  { %v9_v1 = vld [vmem:[#allocation0] sm:$0x3]  }
   0xa   :  { %10 = vrot.lane.b32.xlu0 %v9_v1, %s25_s0  ;;  %v15_v2 = vld [vmem:[#allocation0] sm:$0x3]  }
   0xb   :  { %v6_v3 = vld [vmem:[#allocation0] sm:$0x3]  }
   0xc   :  { %8 = vst.msk [vmem:[%s50_s1] ss:$3 sm:$0x3] %vm7_vm0, %v6_v3  }
  0x12   :  { %16 = vrot.lane.b32.xlu0 %v15_v2, %s26_s8 }
  0x7c   :  { %v11_v4 = vpop.permute.xlu0 %10  }
  0x7d   :  { %21 = vst.msk [vmem:[%s50_s1 + $0x1] ss:$3 sm:$0x3] %vm7_vm0, %v11_v4  }
  0x84   :  { %v17_v5 = vpop.permute.xlu0 %16  }
  0x85   :  { %22 = vst.msk [vmem:[%s50_s1 + $0x2] ss:$3 sm:$0x3] %vm7_vm0, %v17_v5  }

// kernel: normalization_forward.1
= control target key start
LH: loop header
LB: loop body
LE: loop exit
PB: predicated region body
PF: predicated region fallthrough
CT: control target
= control target key end

     0   :  { %v40_v0 = vmov 0   ;;  %s79_s1 = inlined_call_operand.vmem [shape: f32[6,1], index: 1, kind: input, shape index: {}]   ;;  %s80_s2 = inlined_call_operand.vmem [shape: f32[6,1], index: 2, kind: input, shape index: {}]   ;;  %s81_s0 = inlined_call_operand.vmem [shape: f32[6,256], index: 0, kind: input, shape index: {}]   ;;  %s82_s3 = inlined_call_operand.vmem [shape: f32[6,256], index: 3, kind: output, shape index: {}]  }
   0x1   :  { %39 = vset.pattern.permute.xlu0 %v40_v0  ;;  %v16_v1 = vld [vmem:[%s79_s1] sm:$0x3f]  ;;  %v15_v5 = vld [vmem:[%s81_s0 + $0x8] sm:$0x3f] }
   0x2   :  { %19 = vperm.xlu0 %39, %v16_v1   ;;  %v24_v2 = vld [vmem:[%s80_s2] sm:$0x3f] }
   0x3   :  { %v14_v4 = vld [vmem:[%s81_s0] sm:$0x3f] }
   0xa   :  { %27 = vperm.xlu0 %39, %v24_v2  }
  0x74   :  { %v20_v3 = vpop.permute.xlu0 %19 }
  0x75   :  { %v22_v6 = vmul.f32 %v20_v3, %v14_v4  ;;  %v23_v7 = vmul.f32 %v20_v3, %v15_v5 }
  0x7c   :  { %v28_v8 = vpop.permute.xlu0 %27 }
  0x7d   :  { %v30_v9 = vadd.f32 %v28_v8, %v22_v6  ;;  %v31_v10 = vadd.f32 %v28_v8, %v23_v7 }
  0x7f   :  { %32 = vst [vmem:[%s82_s3] sm:$0x3f] %v30_v9 }
  0x80   :  { %33 = vst [vmem:[%s82_s3 + $0x8] sm:$0x3f] %v31_v10 }

</bundles_post_ra>
